<compile_context>
chip_gen: v6e
topology: v6e:2x2x1
jax: 0.10.0
libtpu: 0.0.40
codegen_flags: <defaults>
</compile_context>

<pallas_src>
import functools

import jax
import jax.numpy as jnp
from jax.experimental import pallas as pl
from jax.experimental.pallas import tpu as pltpu

SE_REDUCTION = 16  # config.se_reduction


# ----------------------------------------------------------------------------
# Fused single-pass kernel: NB whole samples per grid step.
# ----------------------------------------------------------------------------
def _se_fused_kernel(inv_hw, x_ref, w1t_ref, b1_ref, w2t_ref, b2_ref, o_ref):
    """x_ref/o_ref: (NB, C, HW).  w1t: (C, R), b1: (1, R), w2t: (R, C), b2: (1, C)."""
    xf = x_ref[...].astype(jnp.float32)                         # (NB, C, HW)
    # AdaptiveAvgPool2d(1): lane-axis reduce per (sample, channel).
    pooled = jnp.sum(xf, axis=-1) * inv_hw                      # (NB, C)
    # Squeeze conv (C -> R) + ReLU, excite conv (R -> C): two tiny MXU matmuls.
    h = jnp.dot(pooled, w1t_ref[...], preferred_element_type=jnp.float32)
    h = jnp.maximum(h + b1_ref[...], 0.0)                       # (NB, R)
    s = jnp.dot(h, w2t_ref[...], preferred_element_type=jnp.float32)
    s = jax.nn.sigmoid(s + b2_ref[...])                         # (NB, C)
    # Scale pass: re-read x from VMEM, multiply in f32, store in output dtype.
    o_ref[...] = (x_ref[...].astype(jnp.float32) * s[:, :, None]).astype(o_ref.dtype)


# ----------------------------------------------------------------------------
# Tiled fallback (large HW): pooling pass + tiny JAX FC + scale pass.
# ----------------------------------------------------------------------------
def _se_pool_kernel(hw, x_ref, o_ref):
    """x_ref: (1, C, THW); o_ref: (1, C, 1) f32 sum-accumulator over the HW axis."""
    hstep = pl.program_id(1)
    thw = x_ref.shape[-1]

    @pl.when(hstep == 0)
    def _():
        o_ref[...] = jnp.zeros_like(o_ref)

    # Mask the (possibly padded) last HW tile so out-of-bounds lanes add zero.
    lane = jax.lax.broadcasted_iota(jnp.int32, x_ref.shape, 2)
    valid = (hstep * thw + lane) < hw
    xf = jnp.where(valid, x_ref[...].astype(jnp.float32), 0.0)
    o_ref[...] += jnp.sum(xf, axis=-1, keepdims=True)


def _se_scale_kernel(x_ref, s_ref, o_ref):
    """x_ref/o_ref: (1, C, THW); s_ref: (1, C, 1) f32 per-channel gate."""
    o_ref[...] = (x_ref[...].astype(jnp.float32) * s_ref[...]).astype(o_ref.dtype)


# ----------------------------------------------------------------------------
# Wrapper
# ----------------------------------------------------------------------------
def _vmem_budget_bytes():
    """~80% of this generation's physical VMEM: ~51 MiB v7x, ~102 MiB v5e/v6e."""
    try:
        cap = int(pltpu.get_tpu_info().vmem_capacity_bytes)
    except Exception:  # conservative fallback
        cap = 64 * 1024 * 1024
    return (cap * 4) // 5


def _largest_divisor_leq(n, cap):
    cap = max(1, min(int(cap), int(n)))
    for d in range(cap, 0, -1):
        if n % d == 0:
            return d
    return 1


def se_block(x, w1, b1, w2, b2, *, force_tiled=False, tile_hw=None):
    """x: (N, C, H, W).  w1: (R, C), b1: (R,), w2: (C, R), b2: (C,).  Returns x * se(x)."""
    N, C, H, W = x.shape
    HW = H * W
    R = w1.shape[0]
    itemsize = x.dtype.itemsize

    x3 = x.reshape(N, C, HW)                       # free relabel, no data movement
    w1t = jnp.transpose(w1).astype(jnp.float32)    # (C, R) tiny
    w2t = jnp.transpose(w2).astype(jnp.float32)    # (R, C) tiny
    b1r = b1.reshape(1, R).astype(jnp.float32)
    b2r = b2.reshape(1, C).astype(jnp.float32)

    budget = _vmem_budget_bytes()
    headroom = 2 * 1024 * 1024
    sample_bytes = C * HW * itemsize
    weight_bytes = (2 * C * R + R + C) * 4

    fused_fits = (4 * sample_bytes + 2 * weight_bytes + headroom) <= budget

    if fused_fits and not force_tiled:
        # Batch samples per grid step; keep >= 2 grid steps for v7x's two cores.
        target = 16 * 1024 * 1024                           # double-buffered in+out target
        nb_fit = max(1, (budget - 2 * weight_bytes - headroom) // (4 * sample_bytes))
        nb_tgt = max(1, target // (4 * sample_bytes))
        nb_cap = min(nb_fit, nb_tgt)
        if N >= 2:
            nb_cap = min(nb_cap, N // 2)
        NB = _largest_divisor_leq(N, nb_cap)
        grid = (N // NB,)

        cost = pl.CostEstimate(
            flops=N * (3 * C * HW + 4 * C * R),
            transcendentals=N * C,                           # sigmoid
            bytes_accessed=2 * N * sample_bytes + weight_bytes,
        )
        out = pl.pallas_call(
            functools.partial(_se_fused_kernel, 1.0 / HW),
            out_shape=jax.ShapeDtypeStruct((N, C, HW), x.dtype),
            grid=grid,
            in_specs=[
                pl.BlockSpec((NB, C, HW), lambda i: (i, 0, 0)),
                pl.BlockSpec((C, R), lambda i: (0, 0)),
                pl.BlockSpec((1, R), lambda i: (0, 0)),
                pl.BlockSpec((R, C), lambda i: (0, 0)),
                pl.BlockSpec((1, C), lambda i: (0, 0)),
            ],
            out_specs=pl.BlockSpec((NB, C, HW), lambda i: (i, 0, 0)),
            compiler_params=pltpu.CompilerParams(
                dimension_semantics=("parallel",),
                vmem_limit_bytes=budget,
            ),
            cost_estimate=cost,
        )(x3, w1t, b1r, w2t, b2r)
        return out.reshape(N, C, H, W)

    # ---------------- Tiled fallback (HW too large for a fused block) --------
    if tile_hw is None:
        thw = max(128, (4 * 1024 * 1024) // max(1, C * itemsize))
        thw = (thw // 128) * 128                              # lane-aligned tile
        tile_hw = min(thw, HW)
    THW = int(tile_hw)
    n_hw = pl.cdiv(HW, THW)

    # Pass 1: HW-tiled pooling (accumulate per-channel sums into a resident block).
    pooled = pl.pallas_call(
        functools.partial(_se_pool_kernel, HW),
        out_shape=jax.ShapeDtypeStruct((N, C, 1), jnp.float32),
        grid=(N, n_hw),
        in_specs=[pl.BlockSpec((1, C, THW), lambda n, h: (n, 0, h))],
        out_specs=pl.BlockSpec((1, C, 1), lambda n, h: (n, 0, 0)),
        compiler_params=pltpu.CompilerParams(
            dimension_semantics=("parallel", "arbitrary"),
            vmem_limit_bytes=budget,
        ),
    )(x3)

    # Tiny FC stack on (N, C): negligible work, plain XLA.
    pooled2 = pooled[:, :, 0] * (1.0 / HW)                    # (N, C)
    hmid = jnp.maximum(pooled2 @ w1t + b1r, 0.0)              # (N, R)
    s = jax.nn.sigmoid(hmid @ w2t + b2r)                      # (N, C)
    s3 = s[:, :, None].astype(jnp.float32)                    # (N, C, 1)

    # Pass 2: HW-tiled scale.
    out = pl.pallas_call(
        _se_scale_kernel,
        out_shape=jax.ShapeDtypeStruct((N, C, HW), x.dtype),
        grid=(N, n_hw),
        in_specs=[
            pl.BlockSpec((1, C, THW), lambda n, h: (n, 0, h)),
            pl.BlockSpec((1, C, 1), lambda n, h: (n, 0, 0)),
        ],
        out_specs=pl.BlockSpec((1, C, THW), lambda n, h: (n, 0, h)),
        compiler_params=pltpu.CompilerParams(
            dimension_semantics=("parallel", "parallel"),
            vmem_limit_bytes=budget,
        ),
    )(x3, s3)
    return out.reshape(N, C, H, W)


# ----------------------------------------------------------------------------
# Reference + self-test
# ----------------------------------------------------------------------------
def se_block_ref(x, w1, b1, w2, b2):
    """Plain-JAX reference matching the PyTorch forward."""
    pooled = jnp.mean(x, axis=(2, 3))                  # (N, C)
    h = jnp.maximum(pooled @ w1.T + b1, 0.0)           # (N, R)
    s = jax.nn.sigmoid(h @ w2.T + b2)                  # (N, C)
    return x * s[:, :, None, None]


def _run_case(key, N, C, H, W, dtype=jnp.float32, atol=1e-5, rtol=1e-5, **kw):
    R = max(1, C // SE_REDUCTION)
    k_x, k_w1, k_b1, k_w2, k_b2 = jax.random.split(key, 5)
    x = jax.random.normal(k_x, (N, C, H, W), dtype=jnp.float32).astype(dtype)
    # nn.Conv2d(C, R, 1) weight (R, C, 1, 1) -> (R, C); synthetic init
    w1 = 0.1 * jax.random.normal(k_w1, (R, C), dtype=jnp.float32)
    b1 = 0.1 * jax.random.normal(k_b1, (R,), dtype=jnp.float32)
    # nn.Conv2d(R, C, 1) weight (C, R, 1, 1) -> (C, R)
    w2 = 0.1 * jax.random.normal(k_w2, (C, R), dtype=jnp.float32)
    b2 = 0.1 * jax.random.normal(k_b2, (C,), dtype=jnp.float32)

    out = jax.block_until_ready(se_block(x, w1, b1, w2, b2, **kw))
    ref = se_block_ref(x.astype(jnp.float32), w1, b1, w2, b2)
    assert out.shape == (N, C, H, W)
    err = float(jnp.max(jnp.abs(out.astype(jnp.float32) - ref)))
    assert jnp.allclose(out.astype(jnp.float32), ref, atol=atol, rtol=rtol), (
        f"max abs err = {err}")


if __name__ == "__main__":
    key = jax.random.PRNGKey(0)
    k1, k2, k3, k4 = jax.random.split(key, 4)
    # Fused path, NB=2 samples per grid step, lane-dense HW (16*16 = 256).
    _run_case(k1, N=4, C=32, H=16, W=16)
    # Fused path, deep-layer shape: C=128, HW=64 (< 128 lanes -> masked stores, still fused).
    _run_case(k2, N=2, C=128, H=8, W=8)
    # Tiled fallback path exercised at small shapes (2 HW tiles of 128).
    _run_case(k3, N=2, C=32, H=16, W=16, force_tiled=True, tile_hw=128)
    # bf16 activations on the wire; math in f32 in-vreg.
    _run_case(k4, N=2, C=128, H=8, W=8, dtype=jnp.bfloat16, atol=3e-2, rtol=3e-2)
    print("KERNEL_OK")
</pallas_src>

<mosaic_0001>
module attributes {stable_mosaic.version = 11 : i64} {
  func.func @_se_fused_kernel(%arg0: i32, %arg1: memref<2x32x256xf32, #tpu.memory_space<vmem>>, %arg2: memref<32x2xf32, #tpu.memory_space<vmem>>, %arg3: memref<1x2xf32, #tpu.memory_space<vmem>>, %arg4: memref<2x32xf32, #tpu.memory_space<vmem>>, %arg5: memref<1x32xf32, #tpu.memory_space<vmem>>, %arg6: memref<2x32x256xf32, #tpu.memory_space<vmem>>) attributes {dimension_semantics = [#tpu.dimension_semantics<parallel>], iteration_bounds = array<i64: 2>, scalar_prefetch = 0 : i64, scratch_operands = 0 : i64, tpu.core_type = #tpu.core_type<tc>, window_params = [{transform_indices = @transform_0, window_bounds = array<i64: 2, 32, 256>}, {pipeline_mode = #tpu.pipeline_mode<synchronous>, transform_indices = @transform_1, window_bounds = array<i64: 32, 2>}, {pipeline_mode = #tpu.pipeline_mode<synchronous>, transform_indices = @transform_2, window_bounds = array<i64: 1, 2>}, {pipeline_mode = #tpu.pipeline_mode<synchronous>, transform_indices = @transform_3, window_bounds = array<i64: 2, 32>}, {pipeline_mode = #tpu.pipeline_mode<synchronous>, transform_indices = @transform_4, window_bounds = array<i64: 1, 32>}, {transform_indices = @transform_5, window_bounds = array<i64: 2, 32, 256>}]} {
    %c0 = arith.constant 0 : index
    %c0_0 = arith.constant 0 : index
    %c0_1 = arith.constant 0 : index
    %0 = vector.load %arg1[%c0, %c0_0, %c0_1] : memref<2x32x256xf32, #tpu.memory_space<vmem>>, vector<2x32x256xf32>
    %cst = arith.constant dense<0.000000e+00> : vector<2x32xf32>
    %1 = vector.multi_reduction <add>, %0, %cst [2] : vector<2x32x256xf32> to vector<2x32xf32>
    %cst_2 = arith.constant 3.906250e-03 : f32
    %2 = vector.broadcast %cst_2 : f32 to vector<2x32xf32>
    %3 = arith.mulf %1, %2 : vector<2x32xf32>
    %c0_3 = arith.constant 0 : index
    %c0_4 = arith.constant 0 : index
    %4 = vector.load %arg2[%c0_3, %c0_4] : memref<32x2xf32, #tpu.memory_space<vmem>>, vector<32x2xf32>
    %cst_5 = arith.constant dense<0.000000e+00> : vector<2x2xf32>
    %5 = tpu.matmul %3, %4, %cst_5 {dimension_numbers = #tpu.dot_dimension_numbers<[1], [0], [0], [1], [0, 0, 1, 1], [], []>} : vector<2x32xf32>, vector<32x2xf32>, vector<2x2xf32> -> vector<2x2xf32>
    %c0_6 = arith.constant 0 : index
    %c0_7 = arith.constant 0 : index
    %6 = vector.load %arg3[%c0_6, %c0_7] : memref<1x2xf32, #tpu.memory_space<vmem>>, vector<1x2xf32>
    %7 = vector.broadcast %6 : vector<1x2xf32> to vector<2x2xf32>
    %8 = arith.addf %5, %7 : vector<2x2xf32>
    %cst_8 = arith.constant 0.000000e+00 : f32
    %9 = vector.broadcast %cst_8 : f32 to vector<2x2xf32>
    %10 = arith.maximumf %8, %9 : vector<2x2xf32>
    %c0_9 = arith.constant 0 : index
    %c0_10 = arith.constant 0 : index
    %11 = vector.load %arg4[%c0_9, %c0_10] : memref<2x32xf32, #tpu.memory_space<vmem>>, vector<2x32xf32>
    %cst_11 = arith.constant dense<0.000000e+00> : vector<2x32xf32>
    %12 = tpu.matmul %10, %11, %cst_11 {dimension_numbers = #tpu.dot_dimension_numbers<[1], [0], [0], [1], [0, 0, 1, 1], [], []>} : vector<2x2xf32>, vector<2x32xf32>, vector<2x32xf32> -> vector<2x32xf32>
    %c0_12 = arith.constant 0 : index
    %c0_13 = arith.constant 0 : index
    %13 = vector.load %arg5[%c0_12, %c0_13] : memref<1x32xf32, #tpu.memory_space<vmem>>, vector<1x32xf32>
    %14 = vector.broadcast %13 : vector<1x32xf32> to vector<2x32xf32>
    %15 = arith.addf %12, %14 : vector<2x32xf32>
    %16 = arith.negf %15 : vector<2x32xf32>
    %17 = math.exp %16 : vector<2x32xf32>
    %cst_14 = arith.constant 1.000000e+00 : f32
    %18 = vector.broadcast %cst_14 : f32 to vector<2x32xf32>
    %19 = arith.addf %18, %17 : vector<2x32xf32>
    %20 = arith.divf %18, %19 : vector<2x32xf32>
    %c0_15 = arith.constant 0 : index
    %c0_16 = arith.constant 0 : index
    %c0_17 = arith.constant 0 : index
    %21 = vector.load %arg1[%c0_15, %c0_16, %c0_17] : memref<2x32x256xf32, #tpu.memory_space<vmem>>, vector<2x32x256xf32>
    %22 = vector.shape_cast %20 : vector<2x32xf32> to vector<2x32x1xf32>
    %23 = vector.broadcast %22 : vector<2x32x1xf32> to vector<2x32x256xf32>
    %24 = arith.mulf %21, %23 : vector<2x32x256xf32>
    %c0_18 = arith.constant 0 : index
    %c0_19 = arith.constant 0 : index
    %c0_20 = arith.constant 0 : index
    %25 = vector.load %arg6[%c0_18, %c0_19, %c0_20] : memref<2x32x256xf32, #tpu.memory_space<vmem>>, vector<2x32x256xf32>
    tpu.vector_store %arg6[%c0_18, %c0_19, %c0_20], %24 {strides = array<i32>} : memref<2x32x256xf32, #tpu.memory_space<vmem>>, vector<2x32x256xf32>,
    return
  }
  func.func @transform_0(%arg0: i32) -> (i32, i32, i32) {
    %c0_i32 = arith.constant 0 : i32
    %c0_i32_0 = arith.constant 0 : i32
    %c0_i32_1 = arith.constant 0 : i32
    return %arg0, %c0_i32, %c0_i32_0 : i32, i32, i32
  }
  func.func @transform_1(%arg0: i32) -> (i32, i32) {
    %c0_i32 = arith.constant 0 : i32
    %c0_i32_0 = arith.constant 0 : i32
    %c0_i32_1 = arith.constant 0 : i32
    return %c0_i32, %c0_i32_0 : i32, i32
  }
  func.func @transform_2(%arg0: i32) -> (i32, i32) {
    %c0_i32 = arith.constant 0 : i32
    %c0_i32_0 = arith.constant 0 : i32
    %c0_i32_1 = arith.constant 0 : i32
    return %c0_i32, %c0_i32_0 : i32, i32
  }
  func.func @transform_3(%arg0: i32) -> (i32, i32) {
    %c0_i32 = arith.constant 0 : i32
    %c0_i32_0 = arith.constant 0 : i32
    %c0_i32_1 = arith.constant 0 : i32
    return %c0_i32, %c0_i32_0 : i32, i32
  }
  func.func @transform_4(%arg0: i32) -> (i32, i32) {
    %c0_i32 = arith.constant 0 : i32
    %c0_i32_0 = arith.constant 0 : i32
    %c0_i32_1 = arith.constant 0 : i32
    return %c0_i32, %c0_i32_0 : i32, i32
  }
  func.func @transform_5(%arg0: i32) -> (i32, i32, i32) {
    %c0_i32 = arith.constant 0 : i32
    %c0_i32_0 = arith.constant 0 : i32
    %c0_i32_1 = arith.constant 0 : i32
    return %arg0, %c0_i32, %c0_i32_0 : i32, i32, i32
  }
}

</mosaic_0001>

<bundles_post_ra>
// kernel: tpu_custom_call.1
= control target key start
LH: loop header
LB: loop body
LE: loop exit
PB: predicated region body
PF: predicated region fallthrough
CT: control target
= control target key end

     0   :  { %10 = vsyncpa [#allocation3], 0  ;;  %s1192_s0 = inlined_call_operand.hbm [shape: f32[4,32,256], index: 0, kind: input, shape index: {}]   ;;  %s1193_s1 = inlined_call_operand.vmem [shape: f32[32,2], index: 1, kind: input, shape index: {}]   ;;  %s1194_s2 = inlined_call_operand.vmem [shape: f32[1,2], index: 2, kind: input, shape index: {}]   ;;  %s1195_s3 = inlined_call_operand.vmem [shape: f32[2,32], index: 3, kind: input, shape index: {}]   ;;  %s1196_s4 = inlined_call_operand.vmem [shape: f32[1,32], index: 4, kind: input, shape index: {}]   ;;  %s1197_s5 = inlined_call_operand.hbm [shape: f32[4,32,256], index: 5, kind: output, shape index: {}]  }
   0x1   :  { %12 = vsyncpa [#allocation3 + $0x1], 0 }
   0x2   :  { %13 = vsyncpa [#allocation4], 0 }
   0x3   :  { %15 = vsyncpa [#allocation4 + $0x1], 0  ;;  %s922_s18 = smov 0   ;;  %s924_s19 = smov 0  }
   0x4   :  { %s926_s20 = smov 0   ;;  %s928_s21 = smov 0  }
   0x5 LB: > { %s943_s22 = sadd.s32 4294967295, %s882_s21   ;;  %s685_s23 = sadd.s32 4294967294, %s882_s21   ;;  %s882_s21 = sphi %s928_s21, %s1212_s21   ;;  %s878_s20 = sphi %s926_s20, %s1211_s20   ;;  %s874_s19 = sphi %s924_s19, %s1210_s19   ;;  %s870_s18 = sphi %s922_s18, %s1209_s18  }
   0x6   : > { %s947_s24 = sadd.s32 1, %s882_s21   ;;  %s28_s25 = sadd.s32 1, %s878_s20 }
   0x7   : > { %s25_s26 = ssub.s32 %s882_s21, %s947_s24  ;;  %p35_p0 = scmp.ne.s32.totalorder %s878_s20, %s874_s19 }
   0x8   : > { %p26_p1 = scmp.eq.s32.totalorder %s25_s26, 0  ;;  %p36_p2 = scmp.eq.s32.totalorder %s882_s21, 0 }
   0x9   : > { %p41_p3 = scmp.ne.s32.totalorder %s874_s19, %s870_s18  ;;  %p42_p4 = scmp.eq.s32.totalorder %s943_s22, 0 }
   0xa   : > { %s959_s27 = scalar_select %p26_p1, %s878_s20, %s28_s25  }
   0xb   : > { %p961_p5 = por %p36_p2, %p35_p0  ;;  %p965_p6 = por %p42_p4, %p41_p3 }
   0xc   : > { %p149_p7 = scmp.eq.s32.totalorder %s943_s22, 1  ;;  %p155_p8 = scmp.eq.s32.totalorder %s685_s23, 1 }
   0xd   : > { %s1201_s29 = scalar_select %p965_p6, 1, 0 }
   0xe   : > { %p746_p10 = scmp.lt.s32.totalorder %s882_s21, 2  ;;  %p972_p11 = por %p149_p7, %p35_p0 }
   0xf   : > { %p976_p12 = por %p155_p8, %p41_p3  ;;  %s187_s7 = sand.u32 1, %s878_s20  }
  0x10   : > { %s1202_s30 = scalar_select %p972_p11, 1, 0 }
  0x11   : > { %s1203_s6 = scalar_select %p976_p12, 1, 0 }
  0x12   : > { %s708_s8 = sshll.u32 %s882_s21, 11  ;;  %s688_s9 = sshll.u32 %s187_s7, 7 }
  0x13   : > { %s985_s12 = scalar_lea.hbm %s1192_s0, %s708_s8  ;;  %s191_s13 = scalar_lea.vmem [#allocation2], %s688_s9 }
  0x14   : > { %s199_s14 = sshll.u32 %s191_s13, 4  ;;  %p989_p13 = pnand %p746_p10, %p961_p5  ;;  %s993_s14 = int_to_ptr.vmem [resolvable:$true] %s199_s14 }
  0x15   : > { %s995_s16 = scalar_lea.sflag [#allocation3], %s187_s7  ;;  %s790_s17 = scalar_lea.hbm %s985_s12, 2048 }
  0x16   : > { %p791_p0 = scmp.ne.s32.totalorder %s985_s12, %s790_s17  ;;  %p792_p1 = pneg %p989_p13 }
  0x17   : > { %s795_s26 = scalar_lea.hbm %s1192_s0, 4096  ;;  %p796_p4 = scmp.lt.s32.totalorder %s985_s12, %s1192_s0 }
  0x18   : > { %p793_p2 = pnand %p792_p1, %p791_p0  ;;  %p797_p5 = scmp.lt.s32.totalorder %s795_s26, %s790_s17 }
  0x1a   : > { %p794_p3 = pneg %p793_p2  ;;  %p798_p7 = por %p797_p5, %p796_p4 }
  0x1c   : > { %p799_p8 = pnand %p798_p7, %p794_p3 }
  0x1e   : > { %802 = shalt.err (!%p799_p8)
}
  0x1f   : > { %s803_s7 = scalar_lea.vmem %s993_s14, 2048  ;;  %s884_s9 = smov [#allocation2]  }
  0x20   : > { %p804_p10 = scmp.ne.s32.totalorder %s993_s14, %s803_s7  ;;  %s808_s10 = sshll.u32 %s884_s9, 4  ;;  %s809_s10 = int_to_ptr.vmem [resolvable:$false] %s808_s10 }
  0x21   : > { %s810_s11 = scalar_lea.vmem %s809_s10, 4096  ;;  %p811_p2 = scmp.lt.s32.totalorder %s993_s14, %s809_s10 }
  0x22   : > { %p806_p9 = pnand %p804_p10, %p792_p1  ;;  %p812_p12 = scmp.lt.s32.totalorder %s810_s11, %s803_s7 }
  0x24   : > { %p807_p0 = pneg %p806_p9  ;;  %p813_p11 = por %p812_p12, %p811_p2 }
  0x26   : > { %p814_p6 = pnand %p813_p11, %p807_p0 }
  0x28   : > { %817 = shalt.err (!%p814_p6)
}
  0x29   : > { %s885_s13 = smov 256   ;;  %s886_s17 = smov 16  }
  0x2a   : > { %741 = dma.hbm_to_vmem [thread:$0]  (!%p989_p13), %s985_s12, 2048, %s993_s14, %s995_s16, %s885_s13, %s885_s13, %s886_s17  }
  0x2b   : > { %p692_p9 = scmp.ge.s32.totalorder %s882_s21, 1  ;;  %p207_p1 = scmp.lt.s32.totalorder %s882_s21, 3 }
  0x2d   : > { %p208_p3 = pnand %p692_p9, %p207_p1 }
  0x2e   : > { %s1019_s23 = sand.u32 (!%p208_p3), 1, %s874_s19   ;;  %p1205_p6 = scmp.ne.s32.totalorder (!%p208_p3), %s1201_s29, 0 }
  0x2f   : > { %211 = sbr.rel (%p208_p3) target bundleno = 786 (0x312), region = 40  ;;  %s693_s25 = sshll.u32 (!%p208_p3), %s1019_s23, 7 }
  0x30   : > { %s214_s26 = scalar_lea.sflag (!%p208_p3), [#allocation3], %s1019_s23  ;;  %s217_s28 = scalar_lea.vmem (!%p208_p3), [#allocation2], %s693_s25 }
  0x34   : > { %861 = dma.done.wait (%p1205_p6), %s214_s26, 2048  }
  0x35   : > { %863 = vsyncadd (%p1205_p6), %s214_s26, 4294965248  ;;  %v1029_v0 = vld [vmem:[%s217_s28 + $0x40] sm:$0xff]  ;;  %v1031_v1 = vld [vmem:[%s217_s28 + $0x48] sm:$0xff]  ;;  %v887_v24 = vmov 0.0   ;;  %vm888_vm0 = vmmov 0   ;;  %v313_v29 = vlaneseq  ;;  %vm324_vm1 = vcmask 130112  }
  0x36   : > { %v1033_v2 = vld [vmem:[%s217_s28] sm:$0xff]  ;;  %v274_v3 = vadd.f32 %v1031_v1, %v1029_v0  ;;  %v1037_v4 = vld [vmem:[%s217_s28 + $0x8] sm:$0xff]  ;;  %v1039_v5 = vld [vmem:[%s217_s28 + $0x50] sm:$0xff]  ;;  %718 = vmatprep.subr.mxu0 %v887_v24  ;;  %729 = vmatprep.subr.mxu1 %v887_v24  ;;  %vm331_vm2 = vcmask 195712   ;;  %vm338_vm3 = vcmask 261312   ;;  %vm359_vm4 = vcmask 1041409  }
  0x37   : > { %v1041_v6 = vld [vmem:[%s217_s28 + $0x58] sm:$0xff]  ;;  %v262_v7 = vadd.f32 %v1037_v4, %v1033_v2  ;;  %v1045_v8 = vld [vmem:[%s217_s28 + $0x10] sm:$0xff]  ;;  %v1053_v12 = vld [vmem:[%s217_s28 + $0x60] sm:$0xff]  ;;  %726 = vmatprep.mubr.msk.f32.mxu0 %vm888_vm0, %v887_v24  ;;  %731 = vmatprep.mubr.msk.f32.mxu1 %vm888_vm0, %v887_v24  ;;  %v314_v31 = vand.u32 127, %v313_v29  ;;  %v1089_v36 = vshrl.u32 %v313_v29, 7  ;;  %vm361_vm5 = vcmask 261120  }
  0x38   : > { %v1047_v9 = vld [vmem:[%s217_s28 + $0x18] sm:$0xff]  ;;  %275 = vadd.xlane.f32.xlu1 %v274_v3  ;;  %v277_v10 = vadd.f32 %v1041_v6, %v1039_v5  ;;  %v1055_v13 = vld [vmem:[%s217_s28 + $0x68] sm:$0xff]  ;;  %v1057_v14 = vld [vmem:[%s217_s28 + $0x20] sm:$0xff]  ;;  %vm447_vm6 = vcmask 1041408   ;;  %vm443_vm7 = vcmask 15360   ;;  %s1112_s29 = scalar_lea.vmem [#allocation5], %s693_s25 }
  0x39   : > { %263 = vadd.xlane.f32.xlu0 %v262_v7  ;;  %v265_v11 = vadd.f32 %v1047_v9, %v1045_v8  ;;  %v1059_v15 = vld [vmem:[%s217_s28 + $0x28] sm:$0xff]  ;;  %v280_v16 = vadd.f32 %v1055_v13, %v1053_v12  ;;  %v1065_v18 = vld [vmem:[%s217_s28 + $0x70] sm:$0xff]  ;;  %v1067_v19 = vld [vmem:[%s217_s28 + $0x78] sm:$0xff]  ;;  %v319_v33 = vadd.s32 4294967288, %v314_v31  ;;  %v326_v35 = vadd.s32 4294967280, %v314_v31  ;;  %s710_s25 = sshll.u32 %s943_s22, 11 }
  0x3a   : > { %v268_v17 = vadd.f32 %v1059_v15, %v1057_v14  ;;  %v1069_v20 = vld [vmem:[%s217_s28 + $0x30] sm:$0xff]  ;;  %v1071_v21 = vld [vmem:[%s217_s28 + $0x38] sm:$0xff]  ;;  %v283_v22 = vadd.f32 %v1067_v19, %v1065_v18  ;;  %v295_v27 = vld [vmem:[%s1193_s1 + $0x8] sm:$0xff]  ;;  %v333_v40 = vadd.s32 4294967272, %v314_v31  ;;  %v317_v44 = vsub.s32 %v314_v31, %v1089_v36  ;;  %s612_s12 = sshll.u32 %s1112_s29, 4  ;;  %s1143_s16 = scalar_lea.hbm %s1197_s5, %s710_s25  ;;  %s1145_s12 = int_to_ptr.vmem [resolvable:$true] %s612_s12 }
  0x3b   : > { %v271_v23 = vadd.f32 %v1071_v21, %v1069_v20  ;;  %v297_v25 = vld [vmem:[%s1193_s1 + $0x18] sm:$0xff]  ;;  %v296_v26 = vld [vmem:[%s1193_s1 + $0x10] sm:$0xff]  ;;  %v294_v28 = vld [vmem:[%s1193_s1] sm:$0xff]  ;;  %v322_v38 = vsub.s32 %v319_v33, %v1089_v36  ;;  %v329_v42 = vsub.s32 %v326_v35, %v1089_v36  ;;  %v529_v35 = vsub.s32 0, %v1089_v36  ;;  %s598_s22 = scalar_lea.sflag [#allocation4], %s1019_s23  ;;  %s818_s8 = scalar_lea.vmem %s1145_s12, 2048 }
  0x3c   : > { %278 = vadd.xlane.f32.xlu1 %v277_v10  ;;  %719 = vmatpush3.msra.mxu0 %v297_v25  ;;  %v336_v51 = vsub.s32 %v333_v40, %v1089_v36  ;;  %p819_p11 = scmp.ne.s32.totalorder %s1145_s12, %s818_s8  ;;  %p1206_p12 = scmp.ne.s32.totalorder %s1202_s30, 0 }
  0x3d   : > { %266 = vadd.xlane.f32.xlu0 %v265_v11  ;;  %720 = vmatprep.subr.mxu0 %v887_v24  ;;  %s889_s7 = smov [#allocation5]  }
  0x3e   : > { %721 = vmatpush3.msra.mxu0 %v296_v26  ;;  %p820_p13 = pnand %p819_p11, %p1206_p12  ;;  %s822_s9 = sshll.u32 %s889_s7, 4  ;;  %s823_s9 = int_to_ptr.vmem [resolvable:$false] %s822_s9 }
  0x3f   : > { %722 = vmatprep.subr.mxu0 %v887_v24  ;;  %s824_s10 = scalar_lea.vmem %s823_s9, 4096  ;;  %p825_p5 = scmp.lt.s32.totalorder %s1145_s12, %s823_s9 }
  0x40   : > { %281 = vadd.xlane.f32.xlu1 %v280_v16  ;;  %723 = vmatpush3.msra.mxu0 %v295_v27  ;;  %p821_p4 = pneg %p820_p13  ;;  %p826_p7 = scmp.lt.s32.totalorder %s824_s10, %s818_s8 }
  0x41   : > { %269 = vadd.xlane.f32.xlu0 %v268_v17  ;;  %724 = vmatprep.subr.mxu0 %v887_v24 }
  0x42   : > { %725 = vmatpush3.msra.mxu0 %v294_v28  ;;  %v697_v28 = vld [vmem:[%s1196_s4] ss:$0 sm:$0xff]  ;;  %p827_p8 = por %p826_p7, %p825_p5 }
  0x44   : > { %284 = vadd.xlane.f32.xlu1 %v283_v22  ;;  %v435_v22 = vld [vmem:[%s1195_s3] sm:$0x3]  ;;  %p828_p10 = pnand %p827_p8, %p821_p4 }
  0x45   : > { %272 = vadd.xlane.f32.xlu0 %v271_v23  ;;  %730 = vmatpush3.msk.msra.mxu1 %vm447_vm6, %v435_v22  ;;  %v695_v23 = vld [vmem:[%s1194_s2] ss:$0 sm:$0xff] }
  0xc1   : > { %v276_v30 = vpop.xlane.xlu1 %275 }
  0xc2   : > { %v264_v32 = vpop.xlane.xlu0 %263  ;;  %v290_v45 = vmul.f32 0.00390625, %v276_v30 }
  0xc3   : > { %v286_v48 = vmul.f32 0.00390625, %v264_v32 }
  0xc4   : > { %v343_v55 = vrot.slane %v290_v45, %v317_v44 }
  0xc5   : > { %v279_v34 = vpop.xlane.xlu1 %278  ;;  %v318_v59 = vrot.slane %v286_v48, %v317_v44 }
  0xc6   : > { %v267_v37 = vpop.xlane.xlu0 %266  ;;  %v291_v39 = vmul.f32 0.00390625, %v279_v34 }
  0xc7   : > { %v287_v41 = vmul.f32 0.00390625, %v267_v37 }
  0xc8   : > { %v347_v50 = vrot.slane %v291_v39, %v322_v38  ;;  %v548_v39 = vsub.s32 1, %v1089_v36 }
  0xc9   : > { %v282_v43 = vpop.xlane.xlu1 %281  ;;  %v323_v52 = vrot.slane %v287_v41, %v322_v38 }
  0xca   : > { %v292_v46 = vmul.f32 0.00390625, %v282_v43  ;;  %v270_v47 = vpop.xlane.xlu0 %269  ;;  %v348_v61 = vsel %vm324_vm1, %v347_v50, %v343_v55 }
  0xcb   : > { %v288_v49 = vmul.f32 0.00390625, %v270_v47  ;;  %v325_v63 = vsel %vm324_vm1, %v323_v52, %v318_v59 }
  0xcc   : > { %v352_v53 = vrot.slane %v292_v46, %v329_v42 }
  0xcd   : > { %v285_v54 = vpop.xlane.xlu1 %284  ;;  %v330_v56 = vrot.slane %v288_v49, %v329_v42 }
  0xce   : > { %v293_v57 = vmul.f32 0.00390625, %v285_v54  ;;  %v273_v58 = vpop.xlane.xlu0 %272  ;;  %v353_v3 = vsel %vm331_vm2, %v352_v53, %v348_v61 }
  0xcf   : > { %v289_v60 = vmul.f32 0.00390625, %v273_v58  ;;  %v332_v10 = vsel %vm331_vm2, %v330_v56, %v325_v63 }
  0xd0   : > { %v357_v62 = vrot.slane %v293_v57, %v336_v51 }
  0xd1   : > { %v337_v7 = vrot.slane %v289_v60, %v336_v51 }
  0xd2   : > { %v358_v11 = vsel %vm338_vm3, %v357_v62, %v353_v3 }
  0xd3   : > { %v339_v16 = vsel %vm338_vm3, %v337_v7, %v332_v10 }
  0xd4   : > { %v360_v17 = vsel %vm359_vm4, %v358_v11, %v339_v16 }
  0xd5   : > { %727 = vmatmul.mubr.msk.f32.vlgmr.msra.gmra.mxu0 %vm361_vm5, %v360_v17 }
 0x195   : > { %v430_v24 = vpop.f32.mrf.mxu0 }
 0x196   : > { %v431_v25 = vadd.f32 %v695_v23, %v430_v24 }
 0x197   : > { %v728_v26 = vpop.f32.mrf.mxu0 }
 0x198   : > { %v434_v27 = vmax.f32 %v431_v25, 0.0 }
 0x19a   : > { %732 = vmatmul.mubr.msk.f32.vlgmr.msra.gmra.mxu1 %vm443_vm7, %v434_v27 }
 0x25a   : > { %v517_v29 = vpop.f32.mrf.mxu1 }
 0x25b   : > { %v518_v30 = vadd.f32 %v697_v28, %v517_v29 }
 0x25c   : > { %v733_v31 = vpop.f32.mrf.mxu1 }
 0x25d   : > { %v700_v32 = vmul.f32 -1.442695, %v518_v30 }
 0x25f   : > { %786 = vpow2.f32 %v700_v32 }
 0x26c   : > { %v787_v33 = vpop.eup %786 }
 0x26d   : > { %v524_v34 = vadd.f32 1.0, %v787_v33 }
 0x26f   : > { %788 = vrcp.f32 %v524_v34 }
 0x27c   : > { %v789_v37 = vpop.eup %788 }
 0x27d   : > { %v530_v38 = vrot.slane %v789_v37, %v529_v35  ;;  %v549_v40 = vrot.slane %v789_v37, %v548_v39 }
 0x27f   : > { %536 = vbcast.lane.b32.xlu1 %v530_v38, 264  ;;  %532 = vbcast.lane.b32.xlu0 %v530_v38, 256 }
 0x283   : > { %540 = vbcast.lane.b32.xlu1 %v530_v38, 272  ;;  %551 = vbcast.lane.b32.xlu0 %v549_v40, 256 }
 0x287   : > { %544 = vbcast.lane.b32.xlu1 %v530_v38, 280  ;;  %559 = vbcast.lane.b32.xlu0 %v549_v40, 272 }
 0x28b   : > { %555 = vbcast.lane.b32.xlu1 %v549_v40, 264 }
 0x28f   : > { %563 = vbcast.lane.b32.xlu1 %v549_v40, 280 }
 0x2f1   : > { %v537_v41 = vpop.permute.xlu1 %536  ;;  %v533_v42 = vpop.permute.xlu0 %532 }
 0x2f2   : > { %v567_v43 = vmul.f32 %v537_v41, %v1045_v8  ;;  %v568_v44 = vmul.f32 %v537_v41, %v1047_v9  ;;  %v565_v45 = vmul.f32 %v533_v42, %v1033_v2  ;;  %v566_v36 = vmul.f32 %v533_v42, %v1037_v4 }
 0x2f4   : > { %583 = vst [vmem:[%s1112_s29 + $0x10] sm:$0xff] %v567_v43  ;;  %584 = vst [vmem:[%s1112_s29 + $0x18] sm:$0xff] %v568_v44 }
 0x2f5   : > { %581 = vst [vmem:[%s1112_s29] sm:$0xff] %v565_v45  ;;  %582 = vst [vmem:[%s1112_s29 + $0x8] sm:$0xff] %v566_v36  ;;  %v541_v8 = vpop.permute.xlu1 %540  ;;  %v552_v2 = vpop.permute.xlu0 %551 }
 0x2f6   : > { %v569_v4 = vmul.f32 %v541_v8, %v1057_v14  ;;  %v570_v9 = vmul.f32 %v541_v8, %v1059_v15  ;;  %v573_v46 = vmul.f32 %v552_v2, %v1029_v0  ;;  %v574_v47 = vmul.f32 %v552_v2, %v1031_v1 }
 0x2f8   : > { %585 = vst [vmem:[%s1112_s29 + $0x20] sm:$0xff] %v569_v4  ;;  %586 = vst [vmem:[%s1112_s29 + $0x28] sm:$0xff] %v570_v9 }
 0x2f9   : > { %589 = vst [vmem:[%s1112_s29 + $0x40] sm:$0xff] %v573_v46  ;;  %590 = vst [vmem:[%s1112_s29 + $0x48] sm:$0xff] %v574_v47  ;;  %v545_v48 = vpop.permute.xlu1 %544  ;;  %v560_v49 = vpop.permute.xlu0 %559 }
 0x2fa   : > { %v571_v14 = vmul.f32 %v545_v48, %v1069_v20  ;;  %v572_v50 = vmul.f32 %v545_v48, %v1071_v21  ;;  %v577_v15 = vmul.f32 %v560_v49, %v1053_v12  ;;  %v578_v0 = vmul.f32 %v560_v49, %v1055_v13 }
 0x2fc   : > { %587 = vst [vmem:[%s1112_s29 + $0x30] sm:$0xff] %v571_v14  ;;  %588 = vst [vmem:[%s1112_s29 + $0x38] sm:$0xff] %v572_v50 }
 0x2fd   : > { %593 = vst [vmem:[%s1112_s29 + $0x60] sm:$0xff] %v577_v15  ;;  %594 = vst [vmem:[%s1112_s29 + $0x68] sm:$0xff] %v578_v0  ;;  %v556_v1 = vpop.permute.xlu1 %555 }
 0x2fe   : > { %v575_v51 = vmul.f32 %v556_v1, %v1039_v5  ;;  %v576_v52 = vmul.f32 %v556_v1, %v1041_v6 }
 0x300   : > { %591 = vst [vmem:[%s1112_s29 + $0x50] sm:$0xff] %v575_v51  ;;  %592 = vst [vmem:[%s1112_s29 + $0x58] sm:$0xff] %v576_v52 }
 0x301   : > { %v564_v12 = vpop.permute.xlu1 %563 }
 0x302   : > { %v579_v5 = vmul.f32 %v564_v12, %v1065_v18  ;;  %v580_v13 = vmul.f32 %v564_v12, %v1067_v19 }
 0x304   : > { %595 = vst [vmem:[%s1112_s29 + $0x70] sm:$0xff] %v579_v5  ;;  %596 = vst [vmem:[%s1112_s29 + $0x78] sm:$0xff] %v580_v13 }
 0x305   : > { %831 = shalt.err (!%p828_p10)
}
 0x306   : > { %s832_s11 = scalar_lea.hbm %s1143_s16, 2048  ;;  %s836_s26 = scalar_lea.hbm %s1197_s5, 4096 }
 0x307   : > { %p833_p0 = scmp.ne.s32.totalorder %s1143_s16, %s832_s11  ;;  %p837_p1 = scmp.lt.s32.totalorder %s1143_s16, %s1197_s5 }
 0x308   : > { %p838_p3 = scmp.lt.s32.totalorder %s836_s26, %s832_s11 }
 0x309   : > { %p834_p2 = pnand %p833_p0, %p1206_p12 }
 0x30a   : > { %p839_p6 = por %p838_p3, %p837_p1 }
 0x30b   : > { %p835_p9 = pneg %p834_p2 }
 0x30d   : > { %p840_p11 = pnand %p839_p6, %p835_p9 }
 0x30f   : > { %843 = shalt.err (!%p840_p11)
}
 0x310   : > { %s890_s25 = smov 256   ;;  %s891_s14 = smov 16  }
 0x311   : > { %736 = dma.vmem_to_hbm [thread:$0]  (%p1206_p12), %s1145_s12, 2048, %s1143_s16, %s598_s22, %s890_s25, %s890_s25, %s891_s14  }
 0x312 PF: > { %s627_s15 = sand.u32 1, %s870_s18   ;;  %p1207_p13 = scmp.ne.s32.totalorder %s1203_s6, 0 }
 0x313   : > { %p1208_p4 = scmp.ge.s32.totalorder %s882_s21, 2  ;;  %s628_s8 = scalar_lea.sflag [#allocation4], %s627_s15 }
 0x315   : > { %p743_p5 = pnand %p1208_p4, %p1207_p13 }
 0x317   : > { %p744_p7 = pneg %p743_p5 }
 0x319   : > { %865 = dma.done.wait (%p744_p7), %s628_s8, 2048  }
 0x31a   : > { %867 = vsyncadd (%p744_p7), %s628_s8, 4294965248  ;;  %p18_p8 = scmp.ge.s32.totalorder %s947_s24, 4   ;;  %s1209_s18 = smov %s874_s19 }
 0x31b   : > { %s1210_s19 = smov %s878_s20  ;;  %s1211_s20 = smov %s959_s27 }
 0x31c   : > { %s1212_s21 = smov %s947_s24  ;;  %20 = sbr.rel (!%p18_p8) target bundleno = 5 (0x5), region = 85 }
 0x321   :  { %633 = vsyncpa [#allocation3], 1 }
 0x322   :  { %635 = vsyncpa [#allocation3 + $0x1], 1 }
 0x323   :  { %636 = vsyncpa [#allocation4], 1 }
 0x324   :  { %638 = vsyncpa [#allocation4 + $0x1], 1 }

</bundles_post_ra>
